<compile_context>
chip_gen: v5e
topology: v5e:2x2
jax: 0.10.0
libtpu: 0.0.40
codegen_flags: <defaults>
</compile_context>

<pallas_src>
import functools

import jax
import jax.numpy as jnp
from jax.experimental import pallas as pl
from jax.experimental.pallas import tpu as pltpu


def _wgap_kernel(x_ref, w_ref, b_ref, o_ref, acc_ref, *, hw_total, inv_hw, use_mxu):
    # x_ref  : (Bt, C, hw_tile)   one spatial tile of one batch block (NCHW)
    # w_ref  : (C, K)             fc weight, transposed  (y = pooled @ W.T + b)
    # b_ref  : (1, K)             fc bias
    # o_ref  : (Bt, K)            per-batch-block logits
    # acc_ref: (Bt, C, 128) f32   lane-dense running spatial sum
    s = pl.program_id(1)
    last_s = pl.num_programs(1) - 1
    bt, c, hw_tile = x_ref.shape
    n_sub = hw_tile // 128

    @pl.when(s == 0)
    def _init():
        acc_ref[...] = jnp.zeros_like(acc_ref)

    def _accumulate(x):
        # Lane-dense accumulation: 128-lane vreg-aligned column slices summed
        # with pure VPU adds (f32), no per-tile cross-lane XLU reduce.
        col_sum = x[..., 0:128].astype(jnp.float32)
        for j in range(1, n_sub):
            col_sum = col_sum + x[..., j * 128:(j + 1) * 128].astype(jnp.float32)
        acc_ref[...] += col_sum

    if hw_total % hw_tile != 0:
        # Only the last spatial tile has an OOB tail: keep steady-state unmasked.
        @pl.when(s != last_s)
        def _steady():
            _accumulate(x_ref[...])

        @pl.when(s == last_s)
        def _tail():
            x = x_ref[...]
            pos = s * hw_tile + jax.lax.broadcasted_iota(jnp.int32, x.shape, 2)
            _accumulate(jnp.where(pos < hw_total, x, jnp.zeros_like(x)))
    else:
        _accumulate(x_ref[...])

    @pl.when(s == last_s)
    def _finalize():
        # Single 128 -> 1 lane reduce, once per batch block.
        pooled = jnp.sum(acc_ref[...], axis=-1) * inv_hw          # (Bt, C) f32
        w = w_ref[...].astype(jnp.float32)                        # (C, K)
        if use_mxu:
            logits = jnp.dot(pooled, w, preferred_element_type=jnp.float32)
        else:
            # Tiny class counts: broadcast-multiply + reduce, no MXU round-trip.
            logits = jnp.sum(pooled[:, :, None] * w[None, :, :], axis=1)
        logits = logits + b_ref[...].astype(jnp.float32)          # (1, K) bcast
        o_ref[...] = logits.astype(o_ref.dtype)


def wgap_forward(x_nchw, fc_weight, fc_bias, *, hw_tile=None, batch_tile=None,
                 vmem_limit_bytes=None):
    """x_nchw: [B, C, H, W]; fc_weight: [K, C]; fc_bias: [K] -> logits [B, K] (f32)."""
    B, C, H, W = x_nchw.shape
    K = fc_weight.shape[0]
    HW = H * W
    x_bytes = jnp.dtype(x_nchw.dtype).itemsize
    p_bytes = jnp.dtype(fc_weight.dtype).itemsize

    # Generation-aware budgets: v5e/v6e have 128 MiB VMEM per core, v7x only 64.
    try:
        vmem_cap = int(pltpu.get_tpu_info().vmem_capacity_bytes)
    except Exception:
        vmem_cap = 64 * 1024 * 1024  # conservative (v7x per-TC) fallback
    x_budget = (8 if vmem_cap >= 96 * 1024 * 1024 else 4) * 1024 * 1024

    # Spatial tile: largest 128-multiple (per batch row) that fits the budget,
    # capped at the 128-padded HW so small feature maps use a single block.
    hw_padded = pl.cdiv(HW, 128) * 128
    if hw_tile is None:
        hw_tile = max(128, (x_budget // max(1, C * x_bytes)) // 128 * 128)
    hw_tile = max(128, min(hw_tile, hw_padded))
    hw_tile = pl.cdiv(hw_tile, 128) * 128
    n_s = pl.cdiv(HW, hw_tile)

    # Batch block: fill the budget with whole batch rows (contiguous HBM slabs),
    # but keep >= 2 blocks on the parallel axis so both v7x TensorCores get work.
    if batch_tile is None:
        batch_tile = max(1, x_budget // max(1, C * hw_tile * x_bytes))
        if B >= 2:
            batch_tile = min(batch_tile, pl.cdiv(B, 2))
    bt = max(1, min(batch_tile, B))
    n_b = pl.cdiv(B, bt)

    x_r = x_nchw.reshape(B, C, HW)      # contiguous collapse: no HBM transpose
    w_mat = fc_weight.T                 # (C, K)
    b_mat = fc_bias.reshape(1, K)       # (1, K)

    if vmem_limit_bytes is None:
        needed = (2 * bt * C * hw_tile * x_bytes   # double-buffered x blocks
                  + 2 * (C + 1) * K * p_bytes      # weight + bias (worst case 2x)
                  + bt * C * 128 * 4               # f32 lane-dense accumulator
                  + 2 * bt * K * 4)                # output block
        vmem_limit_bytes = min(max(int(needed * 1.5) + (4 << 20), 16 << 20),
                               (vmem_cap * 5) // 8)

    kernel = functools.partial(_wgap_kernel, hw_total=HW, inv_hw=1.0 / HW,
                               use_mxu=(K > 16))

    def _build(single_buffer_params):
        w_map = lambda b, s: (0, 0)
        b_map = lambda b, s: (0, 0)
        if single_buffer_params:
            # Constant-index, VMEM-resident params: no need to double-buffer.
            w_spec = pl.BlockSpec((C, K), w_map, pipeline_mode=pl.Buffered(1))
            b_spec = pl.BlockSpec((1, K), b_map, pipeline_mode=pl.Buffered(1))
        else:
            w_spec = pl.BlockSpec((C, K), w_map)
            b_spec = pl.BlockSpec((1, K), b_map)

        grid_spec = pltpu.PrefetchScalarGridSpec(
            num_scalar_prefetch=0,
            grid=(n_b, n_s),
            in_specs=[
                pl.BlockSpec((bt, C, hw_tile), lambda b, s: (b, 0, s)),
                w_spec,
                b_spec,
            ],
            out_specs=pl.BlockSpec((pl.Squeezed(), bt, K), lambda b, s: (b, 0, 0)),
            scratch_shapes=[pltpu.VMEM((bt, C, 128), jnp.float32)],
        )
        return pl.pallas_call(
            kernel,
            out_shape=jax.ShapeDtypeStruct((n_b, bt, K), jnp.float32),
            grid_spec=grid_spec,
            compiler_params=pltpu.CompilerParams(
                dimension_semantics=("parallel", "arbitrary"),
                vmem_limit_bytes=vmem_limit_bytes),
        )

    try:
        out = _build(True)(x_r, w_mat, b_mat)
    except Exception:
        # pl.Buffered(1) single-buffering not supported on this jax build:
        # fall back to default pipelining (footprint already budgeted for 2x).
        out = _build(False)(x_r, w_mat, b_mat)

    # (n_b, bt, K) -> (B, K); drop any padded batch rows.
    return out.reshape(n_b * bt, K)[:B]


if __name__ == "__main__":
    key = jax.random.PRNGKey(0)
    kx, kw, kb, kx2, kw2, kb2 = jax.random.split(key, 6)

    def ref_forward(x, w, b):
        pooled = jnp.mean(x.reshape(x.shape[0], x.shape[1], -1), axis=-1)
        return pooled @ w.T + b

    # 1) Streaming-accumulate path (2 spatial steps), tiny-K VPU finalize.
    B, C, H, W, K = 2, 4, 16, 16, 3
    x = jax.random.normal(kx, (B, C, H, W), dtype=jnp.float32)
    bound = 1.0 / float(C) ** 0.5
    fc_w = jax.random.uniform(kw, (K, C), jnp.float32, -bound, bound)
    fc_b = jax.random.uniform(kb, (K,), jnp.float32, -bound, bound)
    logits = jax.block_until_ready(wgap_forward(x, fc_w, fc_b, hw_tile=128))
    assert logits.shape == (B, K)
    assert jnp.allclose(logits, ref_forward(x, fc_w, fc_b), atol=1e-5, rtol=1e-5)

    # 2) Ragged spatial tail (HW=169 not a multiple of the 128-lane tile):
    #    exercises the last-step-only masking path.
    xr = jax.random.normal(kx2, (B, C, 13, 13), dtype=jnp.float32)
    logits_r = jax.block_until_ready(wgap_forward(xr, fc_w, fc_b, hw_tile=128))
    assert jnp.allclose(logits_r, ref_forward(xr, fc_w, fc_b), atol=1e-5, rtol=1e-5)

    # 3) Batch-tiled small-HW classifier-head regime + MXU finalize (K > 16).
    B3, C3, K3 = 4, 8, 128
    x3 = jax.random.normal(kx, (B3, C3, 7, 7), dtype=jnp.float32)
    bound3 = 1.0 / float(C3) ** 0.5
    w3 = jax.random.uniform(kw2, (K3, C3), jnp.float32, -bound3, bound3)
    b3 = jax.random.uniform(kb2, (K3,), jnp.float32, -bound3, bound3)
    logits3 = jax.block_until_ready(wgap_forward(x3, w3, b3, batch_tile=2))
    assert logits3.shape == (B3, K3)
    assert jnp.allclose(logits3, ref_forward(x3, w3, b3), atol=1e-5, rtol=1e-5)

    print("KERNEL_OK")
</pallas_src>

<mosaic_0001>
module attributes {stable_mosaic.version = 11 : i64} {
  func.func @_wgap_kernel(%arg0: i32, %arg1: i32, %arg2: memref<1x4x128xf32, #tpu.memory_space<vmem>>, %arg3: memref<4x3xf32, #tpu.memory_space<vmem>>, %arg4: memref<1x3xf32, #tpu.memory_space<vmem>>, %arg5: memref<1x1x3xf32, #tpu.memory_space<vmem>>, %arg6: memref<1x4x128xf32, #tpu.memory_space<vmem>>) attributes {dimension_semantics = [#tpu.dimension_semantics<parallel>, #tpu.dimension_semantics<arbitrary>], iteration_bounds = array<i64: 2, 2>, scalar_prefetch = 0 : i64, scratch_operands = 1 : i64, tpu.core_type = #tpu.core_type<tc>, window_params = [{transform_indices = @transform_0, window_bounds = array<i64: 1, 4, 128>}, {pipeline_mode = #tpu.pipeline_mode<synchronous>, transform_indices = @transform_1, window_bounds = array<i64: 4, 3>}, {pipeline_mode = #tpu.pipeline_mode<synchronous>, transform_indices = @transform_2, window_bounds = array<i64: 1, 3>}, {transform_indices = @transform_3, window_bounds = array<i64: 1, 1, 3>}]} {
    %c0_i32 = arith.constant 0 : i32
    %0 = arith.cmpi eq, %arg1, %c0_i32 : i32
    %1 = arith.extui %0 : i1 to i32
    %c0_i32_0 = arith.constant 0 : i32
    %2 = arith.cmpi ne, %1, %c0_i32_0 : i32
    scf.if %2 {
      %cst = arith.constant 0.000000e+00 : f32
      %10 = vector.broadcast %cst : f32 to vector<1x4x128xf32>
      %c0_10 = arith.constant 0 : index
      %c0_11 = arith.constant 0 : index
      %c0_12 = arith.constant 0 : index
      %11 = vector.load %arg6[%c0_10, %c0_11, %c0_12] : memref<1x4x128xf32, #tpu.memory_space<vmem>>, vector<1x4x128xf32>
      tpu.vector_store %arg6[%c0_10, %c0_11, %c0_12], %10 {strides = array<i32>} : memref<1x4x128xf32, #tpu.memory_space<vmem>>, vector<1x4x128xf32>,
    } else {
    }
    %c0 = arith.constant 0 : index
    %c0_1 = arith.constant 0 : index
    %c0_2 = arith.constant 0 : index
    %3 = vector.load %arg2[%c0, %c0_1, %c0_2] : memref<1x4x128xf32, #tpu.memory_space<vmem>>, vector<1x4x128xf32>
    %c0_3 = arith.constant 0 : index
    %c0_4 = arith.constant 0 : index
    %c0_5 = arith.constant 0 : index
    %4 = vector.load %arg6[%c0_3, %c0_4, %c0_5] : memref<1x4x128xf32, #tpu.memory_space<vmem>>, vector<1x4x128xf32>
    %5 = arith.addf %4, %3 : vector<1x4x128xf32>
    %c0_6 = arith.constant 0 : index
    %c0_7 = arith.constant 0 : index
    %c0_8 = arith.constant 0 : index
    %6 = vector.load %arg6[%c0_6, %c0_7, %c0_8] : memref<1x4x128xf32, #tpu.memory_space<vmem>>, vector<1x4x128xf32>
    tpu.vector_store %arg6[%c0_6, %c0_7, %c0_8], %5 {strides = array<i32>} : memref<1x4x128xf32, #tpu.memory_space<vmem>>, vector<1x4x128xf32>,
    %c1_i32 = arith.constant 1 : i32
    %7 = arith.cmpi eq, %arg1, %c1_i32 : i32
    %8 = arith.extui %7 : i1 to i32
    %c0_i32_9 = arith.constant 0 : i32
    %9 = arith.cmpi ne, %8, %c0_i32_9 : i32
    scf.if %9 {
      %c0_10 = arith.constant 0 : index
      %c0_11 = arith.constant 0 : index
      %c0_12 = arith.constant 0 : index
      %10 = vector.load %arg6[%c0_10, %c0_11, %c0_12] : memref<1x4x128xf32, #tpu.memory_space<vmem>>, vector<1x4x128xf32>
      %cst = arith.constant dense<0.000000e+00> : vector<1x4xf32>
      %11 = vector.multi_reduction <add>, %10, %cst [2] : vector<1x4x128xf32> to vector<1x4xf32>
      %cst_13 = arith.constant 3.906250e-03 : f32
      %12 = vector.broadcast %cst_13 : f32 to vector<1x4xf32>
      %13 = arith.mulf %11, %12 : vector<1x4xf32>
      %c0_14 = arith.constant 0 : index
      %c0_15 = arith.constant 0 : index
      %14 = vector.load %arg3[%c0_14, %c0_15] : memref<4x3xf32, #tpu.memory_space<vmem>>, vector<4x3xf32>
      %15 = vector.shape_cast %13 : vector<1x4xf32> to vector<1x4x1xf32>
      %16 = vector.shape_cast %14 : vector<4x3xf32> to vector<1x4x3xf32>
      %17 = vector.broadcast %15 : vector<1x4x1xf32> to vector<1x4x3xf32>
      %18 = arith.mulf %17, %16 : vector<1x4x3xf32>
      %cst_16 = arith.constant dense<0.000000e+00> : vector<1x3xf32>
      %19 = vector.multi_reduction <add>, %18, %cst_16 [1] : vector<1x4x3xf32> to vector<1x3xf32>
      %c0_17 = arith.constant 0 : index
      %c0_18 = arith.constant 0 : index
      %20 = vector.load %arg4[%c0_17, %c0_18] : memref<1x3xf32, #tpu.memory_space<vmem>>, vector<1x3xf32>
      %21 = arith.addf %19, %20 : vector<1x3xf32>
      %c0_19 = arith.constant 0 : index
      %c0_20 = arith.constant 0 : index
      %c0_21 = arith.constant 0 : index
      %22 = vector.load %arg5[%c0_19, %c0_20, %c0_21] : memref<1x1x3xf32, #tpu.memory_space<vmem>>, vector<1x1x3xf32>
      %23 = vector.shape_cast %22 : vector<1x1x3xf32> to vector<1x3xf32>
      %24 = vector.shape_cast %21 : vector<1x3xf32> to vector<1x1x3xf32>
      tpu.vector_store %arg5[%c0_19, %c0_20, %c0_21], %24 {strides = array<i32>} : memref<1x1x3xf32, #tpu.memory_space<vmem>>, vector<1x1x3xf32>,
    } else {
    }
    return
  }
  func.func @transform_0(%arg0: i32, %arg1: i32) -> (i32, i32, i32) {
    %c0_i32 = arith.constant 0 : i32
    %c0_i32_0 = arith.constant 0 : i32
    return %arg0, %c0_i32, %arg1 : i32, i32, i32
  }
  func.func @transform_1(%arg0: i32, %arg1: i32) -> (i32, i32) {
    %c0_i32 = arith.constant 0 : i32
    %c0_i32_0 = arith.constant 0 : i32
    %c0_i32_1 = arith.constant 0 : i32
    return %c0_i32, %c0_i32_0 : i32, i32
  }
  func.func @transform_2(%arg0: i32, %arg1: i32) -> (i32, i32) {
    %c0_i32 = arith.constant 0 : i32
    %c0_i32_0 = arith.constant 0 : i32
    %c0_i32_1 = arith.constant 0 : i32
    return %c0_i32, %c0_i32_0 : i32, i32
  }
  func.func @transform_3(%arg0: i32, %arg1: i32) -> (i32, i32, i32) {
    %c0_i32 = arith.constant 0 : i32
    %c0_i32_0 = arith.constant 0 : i32
    %c0_i32_1 = arith.constant 0 : i32
    return %arg0, %c0_i32, %c0_i32_0 : i32, i32, i32
  }
}

module attributes {stable_mosaic.version = 11 : i64} {
  func.func @_wgap_kernel(%arg0: i32, %arg1: i32, %arg2: memref<1x4x128xf32, #tpu.memory_space<vmem>>, %arg3: memref<4x3xf32, #tpu.memory_space<vmem>>, %arg4: memref<1x3xf32, #tpu.memory_space<vmem>>, %arg5: memref<1x1x3xf32, #tpu.memory_space<vmem>>, %arg6: memref<1x4x128xf32, #tpu.memory_space<vmem>>) attributes {dimension_semantics = [#tpu.dimension_semantics<parallel>, #tpu.dimension_semantics<arbitrary>], iteration_bounds = array<i64: 2, 2>, scalar_prefetch = 0 : i64, scratch_operands = 1 : i64, tpu.core_type = #tpu.core_type<tc>, window_params = [{transform_indices = @transform_0, window_bounds = array<i64: 1, 4, 128>}, {pipeline_mode = #tpu.pipeline_mode<synchronous>, transform_indices = @transform_1, window_bounds = array<i64: 4, 3>}, {pipeline_mode = #tpu.pipeline_mode<synchronous>, transform_indices = @transform_2, window_bounds = array<i64: 1, 3>}, {transform_indices = @transform_3, window_bounds = array<i64: 1, 1, 3>}]} {
    %c0_i32 = arith.constant 0 : i32
    %0 = arith.cmpi eq, %arg1, %c0_i32 : i32
    %1 = arith.extui %0 : i1 to i32
    %c0_i32_0 = arith.constant 0 : i32
    %2 = arith.cmpi ne, %1, %c0_i32_0 : i32
    scf.if %2 {
      %cst = arith.constant 0.000000e+00 : f32
      %10 = vector.broadcast %cst : f32 to vector<1x4x128xf32>
      %c0_10 = arith.constant 0 : index
      %c0_11 = arith.constant 0 : index
      %c0_12 = arith.constant 0 : index
      %11 = vector.load %arg6[%c0_10, %c0_11, %c0_12] : memref<1x4x128xf32, #tpu.memory_space<vmem>>, vector<1x4x128xf32>
      tpu.vector_store %arg6[%c0_10, %c0_11, %c0_12], %10 {strides = array<i32>} : memref<1x4x128xf32, #tpu.memory_space<vmem>>, vector<1x4x128xf32>,
    } else {
    }
    %c0 = arith.constant 0 : index
    %c0_1 = arith.constant 0 : index
    %c0_2 = arith.constant 0 : index
    %3 = vector.load %arg2[%c0, %c0_1, %c0_2] : memref<1x4x128xf32, #tpu.memory_space<vmem>>, vector<1x4x128xf32>
    %c0_3 = arith.constant 0 : index
    %c0_4 = arith.constant 0 : index
    %c0_5 = arith.constant 0 : index
    %4 = vector.load %arg6[%c0_3, %c0_4, %c0_5] : memref<1x4x128xf32, #tpu.memory_space<vmem>>, vector<1x4x128xf32>
    %5 = arith.addf %4, %3 : vector<1x4x128xf32>
    %c0_6 = arith.constant 0 : index
    %c0_7 = arith.constant 0 : index
    %c0_8 = arith.constant 0 : index
    %6 = vector.load %arg6[%c0_6, %c0_7, %c0_8] : memref<1x4x128xf32, #tpu.memory_space<vmem>>, vector<1x4x128xf32>
    tpu.vector_store %arg6[%c0_6, %c0_7, %c0_8], %5 {strides = array<i32>} : memref<1x4x128xf32, #tpu.memory_space<vmem>>, vector<1x4x128xf32>,
    %c1_i32 = arith.constant 1 : i32
    %7 = arith.cmpi eq, %arg1, %c1_i32 : i32
    %8 = arith.extui %7 : i1 to i32
    %c0_i32_9 = arith.constant 0 : i32
    %9 = arith.cmpi ne, %8, %c0_i32_9 : i32
    scf.if %9 {
      %c0_10 = arith.constant 0 : index
      %c0_11 = arith.constant 0 : index
      %c0_12 = arith.constant 0 : index
      %10 = vector.load %arg6[%c0_10, %c0_11, %c0_12] : memref<1x4x128xf32, #tpu.memory_space<vmem>>, vector<1x4x128xf32>
      %cst = arith.constant dense<0.000000e+00> : vector<1x4xf32>
      %11 = vector.multi_reduction <add>, %10, %cst [2] : vector<1x4x128xf32> to vector<1x4xf32>
      %cst_13 = arith.constant 3.906250e-03 : f32
      %12 = vector.broadcast %cst_13 : f32 to vector<1x4xf32>
      %13 = arith.mulf %11, %12 : vector<1x4xf32>
      %c0_14 = arith.constant 0 : index
      %c0_15 = arith.constant 0 : index
      %14 = vector.load %arg3[%c0_14, %c0_15] : memref<4x3xf32, #tpu.memory_space<vmem>>, vector<4x3xf32>
      %15 = vector.shape_cast %13 : vector<1x4xf32> to vector<1x4x1xf32>
      %16 = vector.shape_cast %14 : vector<4x3xf32> to vector<1x4x3xf32>
      %17 = vector.broadcast %15 : vector<1x4x1xf32> to vector<1x4x3xf32>
      %18 = arith.mulf %17, %16 : vector<1x4x3xf32>
      %cst_16 = arith.constant dense<0.000000e+00> : vector<1x3xf32>
      %19 = vector.multi_reduction <add>, %18, %cst_16 [1] : vector<1x4x3xf32> to vector<1x3xf32>
      %c0_17 = arith.constant 0 : index
      %c0_18 = arith.constant 0 : index
      %20 = vector.load %arg4[%c0_17, %c0_18] : memref<1x3xf32, #tpu.memory_space<vmem>>, vector<1x3xf32>
      %21 = arith.addf %19, %20 : vector<1x3xf32>
      %c0_19 = arith.constant 0 : index
      %c0_20 = arith.constant 0 : index
      %c0_21 = arith.constant 0 : index
      %22 = vector.load %arg5[%c0_19, %c0_20, %c0_21] : memref<1x1x3xf32, #tpu.memory_space<vmem>>, vector<1x1x3xf32>
      %23 = vector.shape_cast %22 : vector<1x1x3xf32> to vector<1x3xf32>
      %24 = vector.shape_cast %21 : vector<1x3xf32> to vector<1x1x3xf32>
      tpu.vector_store %arg5[%c0_19, %c0_20, %c0_21], %24 {strides = array<i32>} : memref<1x1x3xf32, #tpu.memory_space<vmem>>, vector<1x1x3xf32>,
    } else {
    }
    return
  }
  func.func @transform_0(%arg0: i32, %arg1: i32) -> (i32, i32, i32) {
    %c0_i32 = arith.constant 0 : i32
    %c0_i32_0 = arith.constant 0 : i32
    return %arg0, %c0_i32, %arg1 : i32, i32, i32
  }
  func.func @transform_1(%arg0: i32, %arg1: i32) -> (i32, i32) {
    %c0_i32 = arith.constant 0 : i32
    %c0_i32_0 = arith.constant 0 : i32
    %c0_i32_1 = arith.constant 0 : i32
    return %c0_i32, %c0_i32_0 : i32, i32
  }
  func.func @transform_2(%arg0: i32, %arg1: i32) -> (i32, i32) {
    %c0_i32 = arith.constant 0 : i32
    %c0_i32_0 = arith.constant 0 : i32
    %c0_i32_1 = arith.constant 0 : i32
    return %c0_i32, %c0_i32_0 : i32, i32
  }
  func.func @transform_3(%arg0: i32, %arg1: i32) -> (i32, i32, i32) {
    %c0_i32 = arith.constant 0 : i32
    %c0_i32_0 = arith.constant 0 : i32
    %c0_i32_1 = arith.constant 0 : i32
    return %arg0, %c0_i32, %c0_i32_0 : i32, i32, i32
  }
}

</mosaic_0001>

<bundles_post_ra>
// kernel: tpu_custom_call.1
= control target key start
LH: loop header
LB: loop body
LE: loop exit
PB: predicated region body
PF: predicated region fallthrough
CT: control target
= control target key end

     0   :  { %s896_s0 = inlined_call_operand.hbm [shape: f32[2,4,256], index: 0, kind: input, shape index: {}]   ;;  %s897_s1 = inlined_call_operand.hbm [shape: f32[4,3], index: 1, kind: input, shape index: {}]   ;;  %s898_s2 = inlined_call_operand.vmem [shape: f32[1,3], index: 2, kind: input, shape index: {}]   ;;  %s899_s3 = inlined_call_operand.hbm [shape: f32[2,1,3], index: 3, kind: output, shape index: {}]  }
   0x1   :  { %906 = sst [smem:[#allocation17_spill]] %s897_s1 }
   0x2   :  { %907 = sst [smem:[#allocation18_spill]] %s898_s2 }
   0x3   :  { %908 = sst [smem:[#allocation19_spill]] %s899_s3 }
   0x4   :  { %8 = vsyncpa [#allocation4], 0 }
   0x5   :  { %10 = vsyncpa [#allocation4 + $0x1], 0 }
   0x6   :  { %11 = vsyncpa [#allocation7], 0 }
   0x7   :  { %12 = vsyncpa [#allocation5], 0 }
   0x8   :  { %14 = vsyncpa [#allocation5 + $0x1], 0  ;;  %s692_s12 = smov 0   ;;  %s694_s13 = smov 0  }
   0x9   :  { %s696_s14 = smov 0   ;;  %s698_s15 = smov 0  }
   0xa   :  { %s700_s16 = smov 0   ;;  %s702_s17 = smov 0  }
   0xb   :  { %s704_s18 = smov 0   ;;  %s706_s19 = smov 0  }
   0xc   :  { %s708_s20 = smov 0   ;;  %s710_s21 = smov 0  }
   0xd   :  { %s712_s22 = smov 0  }
   0xe LB: > { %909 = sst [smem:[#allocation12_spill]] %s628_s12  ;;  %s353_s23 = sadd.s32 4294967295, %s668_s22   ;;  %s668_s22 = sphi %s712_s22, %s20_s22   ;;  %s664_s21 = sphi %s710_s21, %s937_s21   ;;  %s660_s20 = sphi %s708_s20, %s936_s20   ;;  %s656_s19 = sphi %s706_s19, %s935_s19   ;;  %s652_s18 = sphi %s704_s18, %s934_s18   ;;  %s648_s17 = sphi %s702_s17, %s933_s17   ;;  %s644_s16 = sphi %s700_s16, %s932_s16   ;;  %s640_s15 = sphi %s698_s15, %s931_s15   ;;  %s636_s14 = sphi %s696_s14, %s930_s14   ;;  %s632_s13 = sphi %s694_s13, %s929_s13   ;;  %s628_s12 = sphi %s692_s12, %s928_s12  }
   0xf   : > { %910 = sst [smem:[#allocation13_spill]] %s656_s19  ;;  %s354_s24 = sadd.s32 4294967294, %s668_s22  }
  0x10   : > { %p54_p0 = scmp.ne.s32.totalorder %s644_s16, %s640_s15  ;;  %p748_p1 = scmp.eq.s32.totalorder %s353_s23, 0 }
  0x11   : > { %p119_p2 = scmp.ne.s32.totalorder %s636_s14, %s632_s13  ;;  %p120_p3 = scmp.eq.s32.totalorder %s353_s23, 3 }
  0x12   : > { %p756_p4 = por %p748_p1, %p54_p0  ;;  %p125_p5 = scmp.ne.s32.totalorder %s632_s13, %s628_s12 }
  0x13   : > { %p762_p6 = por %p120_p3, %p119_p2  ;;  %p126_p7 = scmp.eq.s32.totalorder %s354_s24, 3 }
  0x14   : > { %p355_p8 = scmp.ge.s32.totalorder %s668_s22, 1  ;;  %p133_p9 = scmp.lt.s32.totalorder %s668_s22, 5 }
  0x15   : > { %s913_s27 = scalar_select %p762_p6, 1, 0 }
  0x16   : > { %p768_p10 = por %p126_p7, %p125_p5  ;;  %p772_p11 = pnand %p355_p8, %p133_p9 }
  0x17   : > { %914 = sst [smem:[#allocation14_spill]] %s913_s27  ;;  %s670_s6 = smov [#allocation6]  }
  0x18   : > { %s915_s28 = scalar_select %p768_p10, 1, 0 }
  0x19   : > { %s918_s1 = sld [smem:[#allocation17_spill]]  ;;  %p376_p12 = pneg %p772_p11 }
  0x1a   : > { %916 = sst [smem:[#allocation15_spill]] %s915_s28  ;;  %s147_s7 = sshll.u32 %s670_s6, 4  ;;  %s148_s7 = int_to_ptr.vmem [resolvable:$true] %s147_s7 }
  0x1b   : > { %p377_p13 = pnand %p376_p12, %p748_p1  ;;  %s29_s8 = sadd.s32 1, %s660_s20 }
  0x1c   : > { %s32_s9 = sadd.s32 1, %s664_s21  ;;  %p30_p0 = scmp.ge.s32.totalorder %s29_s8, 2 }
  0x1d   : > { %s41_s10 = sadd.s32 1, %s648_s17  ;;  %p48_p2 = scmp.ne.s32.totalorder %s648_s17, %s644_s16 }
  0x1e   : > { %p49_p3 = scmp.eq.s32.totalorder %s668_s22, 0  ;;  %s939_s8 = smov (%p30_p0, %s29_s8), 0 }
  0x1f   : > { %s145_s5 = sshll.u32 %s918_s1, 4  ;;  %919 = sst [smem:[#allocation16_spill]] %s939_s8  ;;  %s146_s5 = int_to_ptr.hbm [resolvable:$true] %s145_s5 }
  0x20   : > { %379 = dma.hbm_to_vmem [thread:$0]  (!%p377_p13), %s146_s5, 64, %s148_s7, [#allocation7]  }
  0x21   : > { %s941_s9 = smov (!%p30_p0, %s32_s9), %s664_s21  ;;  %s37_s11 = ssub.s32 %s660_s20, %s939_s8 }
  0x22   : > { %p794_p5 = por %p49_p3, %p48_p2  ;;  %p34_p7 = scmp.ge.s32.totalorder %s941_s9, 2 }
  0x23   : > { %s109_s23 = sadd.s32 1, %s636_s14  ;;  %p389_p8 = scmp.lt.s32.totalorder %s668_s22, 4 }
  0x24   : > { %s161_s24 = sand.u32 1, %s648_s17   ;;  %s943_s9 = smov (%p34_p7, %s941_s9), 0 }
  0x25   : > { %s358_s30 = sshll.u32 %s161_s24, 2  ;;  %s36_s4 = ssub.s32 %s664_s21, %s943_s9 }
  0x26   : > { %s38_s5 = sor.u32 %s37_s11, %s36_s4  ;;  %p107_p9 = scmp.eq.s32.totalorder %s36_s4, 0 }
  0x27   : > { %p39_p12 = scmp.eq.s32.totalorder %s38_s5, 0  ;;  %s359_s6 = sshll.u32 %s664_s21, 1 }
  0x28   : > { %s807_s7 = scalar_select %p107_p9, %s636_s14, %s109_s23  }
  0x29   : > { %s810_s1 = scalar_select %p39_p12, %s648_s17, %s41_s10  }
  0x2a   : > { %s169_s8 = sadd.s32 %s660_s20, %s359_s6  ;;  %s165_s28 = scalar_lea.vmem [#allocation3], %s358_s30 }
  0x2b   : > { %s175_s12 = sshll.u32 %s165_s28, 4  ;;  %s360_s27 = sshll.u32 %s169_s8, 2  ;;  %s176_s12 = int_to_ptr.vmem [resolvable:$true] %s175_s12 }
  0x2c   : > { %s171_s2 = scalar_lea.hbm %s896_s0, %s360_s27  ;;  %p381_p13 = pnand %p389_p8, %p794_p5 }
  0x2d   : > { %s173_s11 = sshll.u32 %s171_s2, 4  ;;  %s162_s4 = scalar_lea.sflag [#allocation4], %s161_s24  ;;  %s174_s11 = int_to_ptr.hbm [resolvable:$true] %s173_s11 }
  0x2e   : > { %383 = dma.hbm_to_vmem [thread:$0]  (!%p381_p13), %s174_s11, 64, %s176_s12, %s162_s4  }
  0x2f   : > { %184 = sbr.rel (%p772_p11) target bundleno = 239 (0xef), region = 32  ;;  %s186_s10 = sand.u32 (!%p772_p11), 1, %s644_s16  }
  0x30   : > { %s362_s28 = sshll.u32 (!%p772_p11), %s186_s10, 2  ;;  %s187_s8 = scalar_lea.sflag (!%p772_p11), [#allocation4], %s186_s10 }
  0x31   : > { %s190_s23 = scalar_lea.vmem (!%p772_p11), [#allocation3], %s362_s28 }
  0x34   : > { %615 = dma.done.wait (%p756_p4), %s187_s8, 64  }
  0x35   : > { %617 = vsyncadd (%p756_p4), %s187_s8, 4294967232 }
  0x36   : > { %619 = dma.done.wait (%p748_p1), [#allocation7], 64  }
  0x37   : > { %621 = vsyncadd (%p748_p1), [#allocation7], 4294967232  ;;  %s216_s2 = sand.u32 1, %s632_s13   ;;  %p364_p11 = scmp.ne.s32.totalorder %s652_s18, 0 }
  0x38   : > { %s834_s3 = scalar_lea.vmem [#allocation8], %s216_s2 }
  0x39   : > { %221 = sbr.rel (%p364_p11) target bundleno = 64 (0x40), region = 44 }
  0x3e   : > { %v671_v0 = vmov 0.0  }
  0x3f   : > { %222 = vst [vmem:[#allocation2] sm:$0xf] %v671_v0 }
  0x40 PF: > { %v223_v1 = vld [vmem:[%s190_s23] sm:$0xf]  ;;  %p365_p4 = scmp.ne.s32.totalorder %s652_s18, 1 }
  0x41   : > { %s921_s18 = sld [smem:[#allocation18_spill]] (!%p365_p4) }
  0x45   : > { %230 = sbr.rel (%p365_p4) target bundleno = 218 (0xda), region = 48 }
  0x46   : > { %v224_v2 = vld [vmem:[#allocation2] sm:$0xf] }
  0x47   : > { %v225_v3 = vadd.f32 %v224_v2, %v223_v1 }
  0x49   : > { %226 = vst [vmem:[#allocation2] sm:$0xf] %v225_v3 }
  0x4a   : > { %vm232_vm0 = vcmask 1043456   ;;  %v237_v7 = vld [vmem:[#allocation6] sm:$0xf]  ;;  %vm239_vm1 = vcmask 19456   ;;  %v247_v16 = vld [vmem:[%s921_s18] sm:$0x1] }
  0x4b   : > { %vm249_vm2 = vcmask 16384  }
  0x50   : > { %v231_v4 = vld [vmem:[#allocation2] sm:$0xf] }
  0x51   : > { %v233_v5 = vsel %vm232_vm0, %v231_v4, 0.0 }
  0x52   : > { %234 = vadd.xlane.f32.xlu0 %v233_v5 }
  0xc5   : > { %v235_v6 = vpop.xlane.xlu0 %234 }
  0xc6   : > { %v236_v8 = vmul.f32 0.00390625, %v235_v6 }
  0xc8   : > { %v238_v9 = vmul.f32 %v237_v7, %v236_v8 }
  0xca   : > { %v240_v10 = vsel %vm239_vm1, %v238_v9, 0.0 }
  0xcb   : > { %v241_v11 = vrot.slane %v240_v10, 4 }
  0xcd   : > { %v242_v12 = vadd.f32 %v241_v11, %v240_v10 }
  0xcf   : > { %v243_v13 = vrot.slane %v242_v12, 2 }
  0xd1   : > { %v244_v14 = vadd.f32 %v243_v13, %v242_v12 }
  0xd3   : > { %v245_v15 = vrot.slane %v244_v14, 1 }
  0xd5   : > { %v246_v17 = vadd.f32 %v245_v15, %v244_v14 }
  0xd7   : > { %v248_v18 = vadd.f32 %v247_v16, %v246_v17 }
  0xd9   : > { %250 = vst.msk [vmem:[%s834_s3] sm:$0x1] %vm249_vm2, %v248_v18 }
  0xda PF: > { %s922_s25 = sld [smem:[#allocation13_spill]]  ;;  %s262_s30 = sshll.u32 %s834_s3, 4  ;;  %s263_s30 = int_to_ptr.vmem [resolvable:$true] %s262_s30 }
  0xdb   : > { %s923_s29 = sld [smem:[#allocation19_spill]]  ;;  %s252_s6 = scalar_lea.sflag [#allocation5], %s216_s2 }
  0xe1   : > { %s260_s24 = scalar_lea.hbm %s923_s29, %s922_s25  ;;  %s562_s8 = scalar_lea.hbm %s923_s29, 2 }
  0xe2   : > { %s264_s5 = sshll.u32 %s260_s24, 4  ;;  %s265_s5 = int_to_ptr.hbm [resolvable:$true] %s264_s5 }
  0xe3   : > { %s556_s11 = sshra.s32 %s265_s5, 4  ;;  %s557_s11 = int_to_ptr.hbm [resolvable:$true] %s556_s11 }
  0xe4   : > { %s558_s4 = scalar_lea.hbm %s557_s11, 1  ;;  %p563_p3 = scmp.lt.s32.totalorder %s557_s11, %s923_s29 }
  0xe5   : > { %p559_p1 = scmp.ne.s32.totalorder %s557_s11, %s558_s4  ;;  %p564_p5 = scmp.lt.s32.totalorder %s562_s8, %s558_s4 }
  0xe7   : > { %p560_p0 = pnand %p559_p1, %p762_p6  ;;  %p565_p7 = por %p564_p5, %p563_p3 }
  0xe9   : > { %p561_p2 = pneg %p560_p0 }
  0xeb   : > { %p566_p8 = pnand %p565_p7, %p561_p2 }
  0xed   : > { %569 = shalt.err (!%p566_p8)
}
  0xee   : > { %374 = dma.vmem_to_hbm [thread:$0]  (%p762_p6), %s263_s30, 16, %s265_s5, %s252_s6  }
  0xef PF: > { %s925_s2 = sld [smem:[#allocation12_spill]]  ;;  %p391_p9 = scmp.ge.s32.totalorder %s668_s22, 2 }
  0xf1   : > { %p385_p12 = pnand %p391_p9, %p768_p10 }
  0xf3   : > { %p386_p13 = pneg %p385_p12 }
  0xf5   : > { %s276_s19 = sand.u32 1, %s925_s2  }
  0xf6   : > { %s277_s18 = scalar_lea.sflag [#allocation5], %s276_s19 }
  0xf7   : > { %623 = dma.done.wait (%p386_p13), %s277_s18, 16  }
  0xf8   : > { %625 = vsyncadd (%p386_p13), %s277_s18, 4294967280  ;;  %s20_s22 = sadd.s32 1, %s668_s22   ;;  %s927_s25 = sld [smem:[#allocation16_spill]] }
  0xf9   : > { %p17_p11 = scmp.ge.s32.totalorder %s20_s22, 6   ;;  %s928_s12 = smov %s632_s13 }
  0xfa   : > { %s929_s13 = smov %s636_s14  ;;  %s930_s14 = smov %s807_s7 }
  0xfb   : > { %s931_s15 = smov %s644_s16  ;;  %s932_s16 = smov %s648_s17 }
  0xfc   : > { %s933_s17 = smov %s810_s1  ;;  %s934_s18 = smov %s660_s20 }
  0xfd   : > { %s935_s19 = smov %s664_s21  ;;  %s937_s21 = smov %s943_s9 }
  0xfe   : > { %s936_s20 = smov %s927_s25  ;;  %19 = sbr.rel (!%p17_p11) target bundleno = 14 (0xe), region = 89 }
 0x103   :  { %282 = vsyncpa [#allocation4], 1 }
 0x104   :  { %284 = vsyncpa [#allocation4 + $0x1], 1 }
 0x105   :  { %285 = vsyncpa [#allocation7], 1 }
 0x106   :  { %286 = vsyncpa [#allocation5], 1 }
 0x107   :  { %288 = vsyncpa [#allocation5 + $0x1], 1 }

// kernel: tpu_custom_call.1
= control target key start
LH: loop header
LB: loop body
LE: loop exit
PB: predicated region body
PF: predicated region fallthrough
CT: control target
= control target key end

     0   :  { %s896_s0 = inlined_call_operand.hbm [shape: f32[2,4,256], index: 0, kind: input, shape index: {}]   ;;  %s897_s1 = inlined_call_operand.hbm [shape: f32[4,3], index: 1, kind: input, shape index: {}]   ;;  %s898_s2 = inlined_call_operand.vmem [shape: f32[1,3], index: 2, kind: input, shape index: {}]   ;;  %s899_s3 = inlined_call_operand.hbm [shape: f32[2,1,3], index: 3, kind: output, shape index: {}]  }
   0x1   :  { %906 = sst [smem:[#allocation17_spill]] %s897_s1 }
   0x2   :  { %907 = sst [smem:[#allocation18_spill]] %s898_s2 }
   0x3   :  { %908 = sst [smem:[#allocation19_spill]] %s899_s3 }
   0x4   :  { %8 = vsyncpa [#allocation4], 0 }
   0x5   :  { %10 = vsyncpa [#allocation4 + $0x1], 0 }
   0x6   :  { %11 = vsyncpa [#allocation7], 0 }
   0x7   :  { %12 = vsyncpa [#allocation5], 0 }
   0x8   :  { %14 = vsyncpa [#allocation5 + $0x1], 0  ;;  %s692_s12 = smov 0   ;;  %s694_s13 = smov 0  }
   0x9   :  { %s696_s14 = smov 0   ;;  %s698_s15 = smov 0  }
   0xa   :  { %s700_s16 = smov 0   ;;  %s702_s17 = smov 0  }
   0xb   :  { %s704_s18 = smov 0   ;;  %s706_s19 = smov 0  }
   0xc   :  { %s708_s20 = smov 0   ;;  %s710_s21 = smov 0  }
   0xd   :  { %s712_s22 = smov 0  }
   0xe LB: > { %909 = sst [smem:[#allocation12_spill]] %s628_s12  ;;  %s353_s23 = sadd.s32 4294967295, %s668_s22   ;;  %s668_s22 = sphi %s712_s22, %s20_s22   ;;  %s664_s21 = sphi %s710_s21, %s937_s21   ;;  %s660_s20 = sphi %s708_s20, %s936_s20   ;;  %s656_s19 = sphi %s706_s19, %s935_s19   ;;  %s652_s18 = sphi %s704_s18, %s934_s18   ;;  %s648_s17 = sphi %s702_s17, %s933_s17   ;;  %s644_s16 = sphi %s700_s16, %s932_s16   ;;  %s640_s15 = sphi %s698_s15, %s931_s15   ;;  %s636_s14 = sphi %s696_s14, %s930_s14   ;;  %s632_s13 = sphi %s694_s13, %s929_s13   ;;  %s628_s12 = sphi %s692_s12, %s928_s12  }
   0xf   : > { %910 = sst [smem:[#allocation13_spill]] %s656_s19  ;;  %s354_s24 = sadd.s32 4294967294, %s668_s22  }
  0x10   : > { %p54_p0 = scmp.ne.s32.totalorder %s644_s16, %s640_s15  ;;  %p748_p1 = scmp.eq.s32.totalorder %s353_s23, 0 }
  0x11   : > { %p119_p2 = scmp.ne.s32.totalorder %s636_s14, %s632_s13  ;;  %p120_p3 = scmp.eq.s32.totalorder %s353_s23, 3 }
  0x12   : > { %p756_p4 = por %p748_p1, %p54_p0  ;;  %p125_p5 = scmp.ne.s32.totalorder %s632_s13, %s628_s12 }
  0x13   : > { %p762_p6 = por %p120_p3, %p119_p2  ;;  %p126_p7 = scmp.eq.s32.totalorder %s354_s24, 3 }
  0x14   : > { %p355_p8 = scmp.ge.s32.totalorder %s668_s22, 1  ;;  %p133_p9 = scmp.lt.s32.totalorder %s668_s22, 5 }
  0x15   : > { %s913_s27 = scalar_select %p762_p6, 1, 0 }
  0x16   : > { %p768_p10 = por %p126_p7, %p125_p5  ;;  %p772_p11 = pnand %p355_p8, %p133_p9 }
  0x17   : > { %914 = sst [smem:[#allocation14_spill]] %s913_s27  ;;  %s670_s6 = smov [#allocation6]  }
  0x18   : > { %s915_s28 = scalar_select %p768_p10, 1, 0 }
  0x19   : > { %s918_s1 = sld [smem:[#allocation17_spill]]  ;;  %p376_p12 = pneg %p772_p11 }
  0x1a   : > { %916 = sst [smem:[#allocation15_spill]] %s915_s28  ;;  %s147_s7 = sshll.u32 %s670_s6, 4  ;;  %s148_s7 = int_to_ptr.vmem [resolvable:$true] %s147_s7 }
  0x1b   : > { %p377_p13 = pnand %p376_p12, %p748_p1  ;;  %s29_s8 = sadd.s32 1, %s660_s20 }
  0x1c   : > { %s32_s9 = sadd.s32 1, %s664_s21  ;;  %p30_p0 = scmp.ge.s32.totalorder %s29_s8, 2 }
  0x1d   : > { %s41_s10 = sadd.s32 1, %s648_s17  ;;  %p48_p2 = scmp.ne.s32.totalorder %s648_s17, %s644_s16 }
  0x1e   : > { %p49_p3 = scmp.eq.s32.totalorder %s668_s22, 0  ;;  %s939_s8 = smov (%p30_p0, %s29_s8), 0 }
  0x1f   : > { %s145_s5 = sshll.u32 %s918_s1, 4  ;;  %919 = sst [smem:[#allocation16_spill]] %s939_s8  ;;  %s146_s5 = int_to_ptr.hbm [resolvable:$true] %s145_s5 }
  0x20   : > { %379 = dma.hbm_to_vmem [thread:$0]  (!%p377_p13), %s146_s5, 64, %s148_s7, [#allocation7]  }
  0x21   : > { %s941_s9 = smov (!%p30_p0, %s32_s9), %s664_s21  ;;  %s37_s11 = ssub.s32 %s660_s20, %s939_s8 }
  0x22   : > { %p794_p5 = por %p49_p3, %p48_p2  ;;  %p34_p7 = scmp.ge.s32.totalorder %s941_s9, 2 }
  0x23   : > { %s109_s23 = sadd.s32 1, %s636_s14  ;;  %p389_p8 = scmp.lt.s32.totalorder %s668_s22, 4 }
  0x24   : > { %s161_s24 = sand.u32 1, %s648_s17   ;;  %s943_s9 = smov (%p34_p7, %s941_s9), 0 }
  0x25   : > { %s358_s30 = sshll.u32 %s161_s24, 2  ;;  %s36_s4 = ssub.s32 %s664_s21, %s943_s9 }
  0x26   : > { %s38_s5 = sor.u32 %s37_s11, %s36_s4  ;;  %p107_p9 = scmp.eq.s32.totalorder %s36_s4, 0 }
  0x27   : > { %p39_p12 = scmp.eq.s32.totalorder %s38_s5, 0  ;;  %s359_s6 = sshll.u32 %s664_s21, 1 }
  0x28   : > { %s807_s7 = scalar_select %p107_p9, %s636_s14, %s109_s23  }
  0x29   : > { %s810_s1 = scalar_select %p39_p12, %s648_s17, %s41_s10  }
  0x2a   : > { %s169_s8 = sadd.s32 %s660_s20, %s359_s6  ;;  %s165_s28 = scalar_lea.vmem [#allocation3], %s358_s30 }
  0x2b   : > { %s175_s12 = sshll.u32 %s165_s28, 4  ;;  %s360_s27 = sshll.u32 %s169_s8, 2  ;;  %s176_s12 = int_to_ptr.vmem [resolvable:$true] %s175_s12 }
  0x2c   : > { %s171_s2 = scalar_lea.hbm %s896_s0, %s360_s27  ;;  %p381_p13 = pnand %p389_p8, %p794_p5 }
  0x2d   : > { %s173_s11 = sshll.u32 %s171_s2, 4  ;;  %s162_s4 = scalar_lea.sflag [#allocation4], %s161_s24  ;;  %s174_s11 = int_to_ptr.hbm [resolvable:$true] %s173_s11 }
  0x2e   : > { %383 = dma.hbm_to_vmem [thread:$0]  (!%p381_p13), %s174_s11, 64, %s176_s12, %s162_s4  }
  0x2f   : > { %184 = sbr.rel (%p772_p11) target bundleno = 239 (0xef), region = 32  ;;  %s186_s10 = sand.u32 (!%p772_p11), 1, %s644_s16  }
  0x30   : > { %s362_s28 = sshll.u32 (!%p772_p11), %s186_s10, 2  ;;  %s187_s8 = scalar_lea.sflag (!%p772_p11), [#allocation4], %s186_s10 }
  0x31   : > { %s190_s23 = scalar_lea.vmem (!%p772_p11), [#allocation3], %s362_s28 }
  0x34   : > { %615 = dma.done.wait (%p756_p4), %s187_s8, 64  }
  0x35   : > { %617 = vsyncadd (%p756_p4), %s187_s8, 4294967232 }
  0x36   : > { %619 = dma.done.wait (%p748_p1), [#allocation7], 64  }
  0x37   : > { %621 = vsyncadd (%p748_p1), [#allocation7], 4294967232  ;;  %s216_s2 = sand.u32 1, %s632_s13   ;;  %p364_p11 = scmp.ne.s32.totalorder %s652_s18, 0 }
  0x38   : > { %s834_s3 = scalar_lea.vmem [#allocation8], %s216_s2 }
  0x39   : > { %221 = sbr.rel (%p364_p11) target bundleno = 64 (0x40), region = 44 }
  0x3e   : > { %v671_v0 = vmov 0.0  }
  0x3f   : > { %222 = vst [vmem:[#allocation2] sm:$0xf] %v671_v0 }
  0x40 PF: > { %v223_v1 = vld [vmem:[%s190_s23] sm:$0xf]  ;;  %p365_p4 = scmp.ne.s32.totalorder %s652_s18, 1 }
  0x41   : > { %s921_s18 = sld [smem:[#allocation18_spill]] (!%p365_p4) }
  0x45   : > { %230 = sbr.rel (%p365_p4) target bundleno = 218 (0xda), region = 48 }
  0x46   : > { %v224_v2 = vld [vmem:[#allocation2] sm:$0xf] }
  0x47   : > { %v225_v3 = vadd.f32 %v224_v2, %v223_v1 }
  0x49   : > { %226 = vst [vmem:[#allocation2] sm:$0xf] %v225_v3 }
  0x4a   : > { %vm232_vm0 = vcmask 1043456   ;;  %v237_v7 = vld [vmem:[#allocation6] sm:$0xf]  ;;  %vm239_vm1 = vcmask 19456   ;;  %v247_v16 = vld [vmem:[%s921_s18] sm:$0x1] }
  0x4b   : > { %vm249_vm2 = vcmask 16384  }
  0x50   : > { %v231_v4 = vld [vmem:[#allocation2] sm:$0xf] }
  0x51   : > { %v233_v5 = vsel %vm232_vm0, %v231_v4, 0.0 }
  0x52   : > { %234 = vadd.xlane.f32.xlu0 %v233_v5 }
  0xc5   : > { %v235_v6 = vpop.xlane.xlu0 %234 }
  0xc6   : > { %v236_v8 = vmul.f32 0.00390625, %v235_v6 }
  0xc8   : > { %v238_v9 = vmul.f32 %v237_v7, %v236_v8 }
  0xca   : > { %v240_v10 = vsel %vm239_vm1, %v238_v9, 0.0 }
  0xcb   : > { %v241_v11 = vrot.slane %v240_v10, 4 }
  0xcd   : > { %v242_v12 = vadd.f32 %v241_v11, %v240_v10 }
  0xcf   : > { %v243_v13 = vrot.slane %v242_v12, 2 }
  0xd1   : > { %v244_v14 = vadd.f32 %v243_v13, %v242_v12 }
  0xd3   : > { %v245_v15 = vrot.slane %v244_v14, 1 }
  0xd5   : > { %v246_v17 = vadd.f32 %v245_v15, %v244_v14 }
  0xd7   : > { %v248_v18 = vadd.f32 %v247_v16, %v246_v17 }
  0xd9   : > { %250 = vst.msk [vmem:[%s834_s3] sm:$0x1] %vm249_vm2, %v248_v18 }
  0xda PF: > { %s922_s25 = sld [smem:[#allocation13_spill]]  ;;  %s262_s30 = sshll.u32 %s834_s3, 4  ;;  %s263_s30 = int_to_ptr.vmem [resolvable:$true] %s262_s30 }
  0xdb   : > { %s923_s29 = sld [smem:[#allocation19_spill]]  ;;  %s252_s6 = scalar_lea.sflag [#allocation5], %s216_s2 }
  0xe1   : > { %s260_s24 = scalar_lea.hbm %s923_s29, %s922_s25  ;;  %s562_s8 = scalar_lea.hbm %s923_s29, 2 }
  0xe2   : > { %s264_s5 = sshll.u32 %s260_s24, 4  ;;  %s265_s5 = int_to_ptr.hbm [resolvable:$true] %s264_s5 }
  0xe3   : > { %s556_s11 = sshra.s32 %s265_s5, 4  ;;  %s557_s11 = int_to_ptr.hbm [resolvable:$true] %s556_s11 }
  0xe4   : > { %s558_s4 = scalar_lea.hbm %s557_s11, 1  ;;  %p563_p3 = scmp.lt.s32.totalorder %s557_s11, %s923_s29 }
  0xe5   : > { %p559_p1 = scmp.ne.s32.totalorder %s557_s11, %s558_s4  ;;  %p564_p5 = scmp.lt.s32.totalorder %s562_s8, %s558_s4 }
  0xe7   : > { %p560_p0 = pnand %p559_p1, %p762_p6  ;;  %p565_p7 = por %p564_p5, %p563_p3 }
  0xe9   : > { %p561_p2 = pneg %p560_p0 }
  0xeb   : > { %p566_p8 = pnand %p565_p7, %p561_p2 }
  0xed   : > { %569 = shalt.err (!%p566_p8)
}
  0xee   : > { %374 = dma.vmem_to_hbm [thread:$0]  (%p762_p6), %s263_s30, 16, %s265_s5, %s252_s6  }
  0xef PF: > { %s925_s2 = sld [smem:[#allocation12_spill]]  ;;  %p391_p9 = scmp.ge.s32.totalorder %s668_s22, 2 }
  0xf1   : > { %p385_p12 = pnand %p391_p9, %p768_p10 }
  0xf3   : > { %p386_p13 = pneg %p385_p12 }
  0xf5   : > { %s276_s19 = sand.u32 1, %s925_s2  }
  0xf6   : > { %s277_s18 = scalar_lea.sflag [#allocation5], %s276_s19 }
  0xf7   : > { %623 = dma.done.wait (%p386_p13), %s277_s18, 16  }
  0xf8   : > { %625 = vsyncadd (%p386_p13), %s277_s18, 4294967280  ;;  %s20_s22 = sadd.s32 1, %s668_s22   ;;  %s927_s25 = sld [smem:[#allocation16_spill]] }
  0xf9   : > { %p17_p11 = scmp.ge.s32.totalorder %s20_s22, 6   ;;  %s928_s12 = smov %s632_s13 }
  0xfa   : > { %s929_s13 = smov %s636_s14  ;;  %s930_s14 = smov %s807_s7 }
  0xfb   : > { %s931_s15 = smov %s644_s16  ;;  %s932_s16 = smov %s648_s17 }
  0xfc   : > { %s933_s17 = smov %s810_s1  ;;  %s934_s18 = smov %s660_s20 }
  0xfd   : > { %s935_s19 = smov %s664_s21  ;;  %s937_s21 = smov %s943_s9 }
  0xfe   : > { %s936_s20 = smov %s927_s25  ;;  %19 = sbr.rel (!%p17_p11) target bundleno = 14 (0xe), region = 89 }
 0x103   :  { %282 = vsyncpa [#allocation4], 1 }
 0x104   :  { %284 = vsyncpa [#allocation4 + $0x1], 1 }
 0x105   :  { %285 = vsyncpa [#allocation7], 1 }
 0x106   :  { %286 = vsyncpa [#allocation5], 1 }
 0x107   :  { %288 = vsyncpa [#allocation5 + $0x1], 1 }

</bundles_post_ra>
